<compile_context>
chip_gen: v5e
topology: v5e:2x2
jax: 0.10.0
libtpu: 0.0.40
codegen_flags: <defaults>
</compile_context>

<pallas_src>
import jax
import jax.numpy as jnp
from jax import lax
from jax.experimental import pallas as pl
from jax.experimental.pallas import tpu as pltpu

LANE = 128
_VMEM_LIMIT = 32 * 1024 * 1024  # explicit scoped-VMEM budget, safe on v5e/v6e/v7x


def _round_up(v, m):
    return ((v + m - 1) // m) * m


# ---------------------------------------------------------------------------
# Pass A: conv1 -> ReLU -> conv2 -> ReLU  (+ per-sample BN partial statistics)
# ---------------------------------------------------------------------------
def _conv_block_kernel(x_ref, w1_ref, b1_ref, w2_ref, b2_ref, h_ref, stats_ref):
    # x_ref    : (1, L+2, Cin_p)   edge-padded (replicate) input, channels-last
    # w1_ref   : (3*Cin_p, Cout_p) the 3 taps stacked along K (one fused matmul)
    # b1_ref   : (1, Cout_p)
    # w2_ref   : (3*Cout_p, Cout_p)
    # b2_ref   : (1, Cout_p)
    # h_ref    : (1, L+2, Cout_p)  edge-padded pre-BN activation (output)
    # stats_ref: (1, 2, Cout_p)    rows = [sum_L h, sum_L h*h] for this sample
    l = x_ref.shape[1] - 2
    x = x_ref[0]                                                   # (L+2, Cin_p)

    # conv1: three k=3 taps as one MXU contraction with K = 3*Cin_p.
    x_cat = jnp.concatenate([x[0:l], x[1:l + 1], x[2:l + 2]], axis=1)
    h1 = jnp.dot(x_cat, w1_ref[...], preferred_element_type=jnp.float32)
    h1 = jnp.maximum(h1 + b1_ref[...], 0.0)                        # (L, Cout_p)

    # conv2: replicate-pad h1 by one row, same fused-tap matmul.
    hp = jnp.concatenate([h1[0:1], h1, h1[l - 1:l]], axis=0)       # (L+2, Cout_p)
    h_cat = jnp.concatenate([hp[0:l], hp[1:l + 1], hp[2:l + 2]], axis=1)
    h2 = jnp.dot(h_cat, w2_ref[...], preferred_element_type=jnp.float32)
    h2 = jnp.maximum(h2 + b2_ref[...], 0.0)                        # (L, Cout_p)

    # Write the activation already edge-padded so pass B needs no re-padding.
    h_ref[0] = jnp.concatenate([h2[0:1], h2, h2[l - 1:l]], axis=0)

    # Single-pass BN partials (sum, sum of squares) for this sample.
    stats_ref[0] = jnp.concatenate(
        [jnp.sum(h2, axis=0, keepdims=True),
         jnp.sum(h2 * h2, axis=0, keepdims=True)], axis=0)


def _conv_block_call(x_pad, w1c, b1, w2c, b2):
    n, lp2, cin_p = x_pad.shape
    cout_p = w1c.shape[1]
    return pl.pallas_call(
        _conv_block_kernel,
        out_shape=(jax.ShapeDtypeStruct((n, lp2, cout_p), jnp.float32),
                   jax.ShapeDtypeStruct((n, 2, cout_p), jnp.float32)),
        grid_spec=pltpu.PrefetchScalarGridSpec(
            num_scalar_prefetch=0,
            grid=(n,),
            in_specs=[
                pl.BlockSpec((1, lp2, cin_p), lambda i: (i, 0, 0)),
                pl.BlockSpec((3 * cin_p, cout_p), lambda i: (0, 0)),   # resident
                pl.BlockSpec((1, cout_p), lambda i: (0, 0)),           # resident
                pl.BlockSpec((3 * cout_p, cout_p), lambda i: (0, 0)),  # resident
                pl.BlockSpec((1, cout_p), lambda i: (0, 0)),           # resident
            ],
            out_specs=[
                pl.BlockSpec((1, lp2, cout_p), lambda i: (i, 0, 0)),
                pl.BlockSpec((1, 2, cout_p), lambda i: (i, 0, 0)),
            ]),
        compiler_params=pltpu.CompilerParams(
            dimension_semantics=("parallel",),
            vmem_limit_bytes=_VMEM_LIMIT),
    )(x_pad, w1c, b1, w2c, b2)


# ---------------------------------------------------------------------------
# Pass B: fused BatchNorm affine + MaxPool1d(kernel=3, stride=2, padding=1)
# ---------------------------------------------------------------------------
def _bn_pool_kernel(h_ref, scale_ref, shift_ref, o_ref):
    # h_ref    : (1, L+2, C)   edge-padded pre-BN activation
    # scale_ref: (1, C)  = gamma * rsqrt(var + eps)
    # shift_ref: (1, C)  = beta - mean * scale
    # o_ref    : (1, Lp+2, C)  edge-padded normalized + pooled output
    l = h_ref.shape[1] - 2
    lp = o_ref.shape[1] - 2
    c = h_ref.shape[2]

    # BN folded into one FMA per element.
    y = h_ref[0] * scale_ref[...] + shift_ref[...]                 # (L+2, C)

    # MaxPool1d(3, 2, 1): in edge-padded coordinates
    #   pooled[j] = max(y[2j], y[2j+1], y[2j+2]);
    # the replicated edge rows reproduce PyTorch's -inf-padding result because
    # every window contains the real edge element.
    m = jnp.maximum(y[0:l + 1], y[1:l + 2])                        # (L+1, C)
    pooled = jnp.max(m[0:2 * lp].reshape(lp, 2, c), axis=1)        # (Lp, C)

    o_ref[0] = jnp.concatenate([pooled[0:1], pooled, pooled[lp - 1:lp]], axis=0)


def _bn_pool_call(h_pad, scale, shift):
    n, lp2, c = h_pad.shape
    l = lp2 - 2
    l_out = (l - 1) // 2 + 1
    return pl.pallas_call(
        _bn_pool_kernel,
        out_shape=jax.ShapeDtypeStruct((n, l_out + 2, c), jnp.float32),
        grid_spec=pltpu.PrefetchScalarGridSpec(
            num_scalar_prefetch=0,
            grid=(n,),
            in_specs=[
                pl.BlockSpec((1, lp2, c), lambda i: (i, 0, 0)),
                pl.BlockSpec((1, c), lambda i: (0, 0)),              # resident
                pl.BlockSpec((1, c), lambda i: (0, 0)),              # resident
            ],
            out_specs=pl.BlockSpec((1, l_out + 2, c), lambda i: (i, 0, 0))),
        compiler_params=pltpu.CompilerParams(
            dimension_semantics=("parallel",),
            vmem_limit_bytes=_VMEM_LIMIT),
    )(h_pad, scale, shift)


# ---------------------------------------------------------------------------
# Parameter packing + Encoder forward
# ---------------------------------------------------------------------------
def prep_block_params(w1, b1, w2, b2, gamma, beta):
    """Pack one Block's PyTorch-layout params into MXU/lane-friendly tensors."""
    c_out, c_in, _ = w1.shape
    cin_p = _round_up(c_in, LANE)
    cout_p = _round_up(c_out, LANE)

    def cat_taps(w, ci, ci_p, co, co_p):
        taps = []
        for k in range(3):
            wk = jnp.zeros((ci_p, co_p), jnp.float32)
            wk = wk.at[:ci, :co].set(jnp.asarray(w[:, :, k], jnp.float32).T)
            taps.append(wk)
        return jnp.concatenate(taps, axis=0)          # (3*ci_p, co_p)

    def pad_row(v):
        row = jnp.zeros((1, cout_p), jnp.float32)
        return row.at[0, :c_out].set(jnp.asarray(v, jnp.float32))

    return dict(
        w1c=cat_taps(w1, c_in, cin_p, c_out, cout_p),
        b1=pad_row(b1),
        w2c=cat_taps(w2, c_out, cout_p, c_out, cout_p),
        b2=pad_row(b2),
        gamma=pad_row(gamma),
        beta=pad_row(beta),
        c_out=c_out,
        cin_p=cin_p,
        cout_p=cout_p,
    )


def encoder_forward(x_ncl, blocks, eps=1e-5):
    """x_ncl: (N, C_in, L) float32.  blocks: list of prep_block_params dicts."""
    n, c_in0, l = x_ncl.shape
    cin_p0 = blocks[0]["cin_p"]

    # NCL -> NLC exactly once; pad channels to the 128-lane width; edge-pad L
    # by 1 (replicate) so the first Block's kernel needs no halo handling.
    x = jnp.transpose(x_ncl, (0, 2, 1)).astype(jnp.float32)
    x = jnp.pad(x, ((0, 0), (0, 0), (0, cin_p0 - c_in0)))
    x = jnp.pad(x, ((0, 0), (1, 1), (0, 0)), mode="edge")      # (N, L+2, cin_p0)

    cur_l = l
    for blk in blocks:
        h_pad, stats = _conv_block_call(x, blk["w1c"], blk["b1"],
                                        blk["w2c"], blk["b2"])
        # Combine per-sample partials into global batch statistics (tiny).
        s = jnp.sum(stats, axis=0)                    # (2, Cout_p)
        cnt = jnp.float32(n * cur_l)
        mean = s[0] / cnt
        var = jnp.maximum(s[1] / cnt - mean * mean, 0.0)
        scale = blk["gamma"][0] * lax.rsqrt(var + eps)
        shift = blk["beta"][0] - mean * scale
        # TODO(synk): BatchNorm running_mean/running_var buffer updates
        #             (stateful side effect, not part of the returned activation)
        #             are not modeled.
        x = _bn_pool_call(h_pad, scale.reshape(1, -1), shift.reshape(1, -1))
        cur_l = (cur_l - 1) // 2 + 1

    c_out_last = blocks[-1]["c_out"]
    out = x[:, 1:cur_l + 1, :c_out_last]              # drop edge pad + lane pad
    return jnp.transpose(out, (0, 2, 1))              # back to (N, C_out, L_out)


# ---------------------------------------------------------------------------
# Pure-JAX reference mirroring PyTorch semantics (NCL layout)
# ---------------------------------------------------------------------------
def encoder_forward_ref(x, raw_blocks, eps=1e-5):
    def conv(inp, w, b):
        xp = jnp.pad(inp, ((0, 0), (0, 0), (1, 1)), mode="edge")
        out = lax.conv_general_dilated(
            xp, w, window_strides=(1,), padding="VALID",
            dimension_numbers=("NCH", "OIH", "NCH"))
        return out + b[None, :, None]

    h = x
    for (w1, b1, w2, b2, gamma, beta) in raw_blocks:
        a = jax.nn.relu(conv(h, w1, b1))
        a = jax.nn.relu(conv(a, w2, b2))
        mean = jnp.mean(a, axis=(0, 2), keepdims=True)
        var = jnp.mean((a - mean) ** 2, axis=(0, 2), keepdims=True)
        a = (a - mean) / jnp.sqrt(var + eps) * gamma[None, :, None] + beta[None, :, None]
        h = lax.reduce_window(a, jnp.float32(-jnp.inf), lax.max,
                              window_dimensions=(1, 1, 3),
                              window_strides=(1, 1, 2),
                              padding=((0, 0), (0, 0), (1, 1)))
    return h


if __name__ == "__main__":
    N, L = 2, 16
    CHS = (1, 64, 128, 256)      # Encoder's default channel progression

    key = jax.random.PRNGKey(0)
    keys = jax.random.split(key, 1 + 4 * (len(CHS) - 1))
    x = jax.random.normal(keys[0], (N, CHS[0], L), dtype=jnp.float32)

    raw_blocks = []
    ki = 1
    for i in range(len(CHS) - 1):
        cin, cout = CHS[i], CHS[i + 1]
        bound1 = 1.0 / (cin * 3) ** 0.5     # PyTorch Conv1d default init bound
        w1 = jax.random.uniform(keys[ki], (cout, cin, 3), jnp.float32, -bound1, bound1); ki += 1
        b1 = jax.random.uniform(keys[ki], (cout,), jnp.float32, -bound1, bound1); ki += 1
        bound2 = 1.0 / (cout * 3) ** 0.5
        w2 = jax.random.uniform(keys[ki], (cout, cout, 3), jnp.float32, -bound2, bound2); ki += 1
        b2 = jax.random.uniform(keys[ki], (cout,), jnp.float32, -bound2, bound2); ki += 1
        gamma = jnp.ones((cout,), jnp.float32)   # BatchNorm1d default affine init
        beta = jnp.zeros((cout,), jnp.float32)
        raw_blocks.append((w1, b1, w2, b2, gamma, beta))

    blocks = [prep_block_params(*p) for p in raw_blocks]

    out = encoder_forward(x, blocks)
    out = jax.block_until_ready(out)

    ref = encoder_forward_ref(x, raw_blocks)
    l_out = L
    for _ in range(len(CHS) - 1):
        l_out = (l_out - 1) // 2 + 1
    assert out.shape == (N, CHS[-1], l_out), out.shape
    assert ref.shape == out.shape
    err = jnp.max(jnp.abs(out - ref))
    assert jnp.allclose(out, ref, atol=2e-3, rtol=2e-3), f"mismatch vs reference, max err={err}"

    print("KERNEL_OK")
</pallas_src>

<mosaic_0001>
module attributes {stable_mosaic.version = 11 : i64} {
  func.func @_conv_block_kernel(%arg0: i32, %arg1: memref<1x18x128xf32, #tpu.memory_space<vmem>>, %arg2: memref<384x128xf32, #tpu.memory_space<vmem>>, %arg3: memref<1x128xf32, #tpu.memory_space<vmem>>, %arg4: memref<384x128xf32, #tpu.memory_space<vmem>>, %arg5: memref<1x128xf32, #tpu.memory_space<vmem>>, %arg6: memref<1x18x128xf32, #tpu.memory_space<vmem>>, %arg7: memref<1x2x128xf32, #tpu.memory_space<vmem>>) attributes {dimension_semantics = [#tpu.dimension_semantics<parallel>], iteration_bounds = array<i64: 2>, scalar_prefetch = 0 : i64, scratch_operands = 0 : i64, tpu.core_type = #tpu.core_type<tc>, window_params = [{transform_indices = @transform_0, window_bounds = array<i64: 1, 18, 128>}, {pipeline_mode = #tpu.pipeline_mode<synchronous>, transform_indices = @transform_1, window_bounds = array<i64: 384, 128>}, {pipeline_mode = #tpu.pipeline_mode<synchronous>, transform_indices = @transform_2, window_bounds = array<i64: 1, 128>}, {pipeline_mode = #tpu.pipeline_mode<synchronous>, transform_indices = @transform_3, window_bounds = array<i64: 384, 128>}, {pipeline_mode = #tpu.pipeline_mode<synchronous>, transform_indices = @transform_4, window_bounds = array<i64: 1, 128>}, {transform_indices = @transform_5, window_bounds = array<i64: 1, 18, 128>}, {transform_indices = @transform_6, window_bounds = array<i64: 1, 2, 128>}]} {
    %c0 = arith.constant 0 : index
    %c0_0 = arith.constant 0 : index
    %c0_1 = arith.constant 0 : index
    %0 = vector.load %arg1[%c0, %c0_0, %c0_1] : memref<1x18x128xf32, #tpu.memory_space<vmem>>, vector<1x18x128xf32>
    %1 = vector.shape_cast %0 : vector<1x18x128xf32> to vector<18x128xf32>
    %2 = vector.extract_strided_slice %1 {offsets = [0, 0], sizes = [16, 128], strides = [1, 1]} : vector<18x128xf32> to vector<16x128xf32>
    %3 = vector.extract_strided_slice %1 {offsets = [1, 0], sizes = [16, 128], strides = [1, 1]} : vector<18x128xf32> to vector<16x128xf32>
    %4 = vector.extract_strided_slice %1 {offsets = [2, 0], sizes = [16, 128], strides = [1, 1]} : vector<18x128xf32> to vector<16x128xf32>
    %5 = tpu.concatenate %2, %3, %4 in 1 : vector<16x128xf32>, vector<16x128xf32>, vector<16x128xf32> -> vector<16x384xf32>
    %c0_2 = arith.constant 0 : index
    %c0_3 = arith.constant 0 : index
    %6 = vector.load %arg2[%c0_2, %c0_3] : memref<384x128xf32, #tpu.memory_space<vmem>>, vector<384x128xf32>
    %cst = arith.constant dense<0.000000e+00> : vector<16x128xf32>
    %7 = tpu.matmul %5, %6, %cst {dimension_numbers = #tpu.dot_dimension_numbers<[1], [0], [0], [1], [0, 0, 1, 1], [], []>} : vector<16x384xf32>, vector<384x128xf32>, vector<16x128xf32> -> vector<16x128xf32>
    %c0_4 = arith.constant 0 : index
    %c0_5 = arith.constant 0 : index
    %8 = vector.load %arg3[%c0_4, %c0_5] : memref<1x128xf32, #tpu.memory_space<vmem>>, vector<1x128xf32>
    %9 = vector.broadcast %8 : vector<1x128xf32> to vector<16x128xf32>
    %10 = arith.addf %7, %9 : vector<16x128xf32>
    %cst_6 = arith.constant 0.000000e+00 : f32
    %11 = vector.broadcast %cst_6 : f32 to vector<16x128xf32>
    %12 = arith.maximumf %10, %11 : vector<16x128xf32>
    %13 = vector.extract_strided_slice %12 {offsets = [0, 0], sizes = [1, 128], strides = [1, 1]} : vector<16x128xf32> to vector<1x128xf32>
    %14 = vector.extract_strided_slice %12 {offsets = [15, 0], sizes = [1, 128], strides = [1, 1]} : vector<16x128xf32> to vector<1x128xf32>
    %15 = tpu.concatenate %13, %12, %14 in 0 : vector<1x128xf32>, vector<16x128xf32>, vector<1x128xf32> -> vector<18x128xf32>
    %16 = vector.extract_strided_slice %15 {offsets = [0, 0], sizes = [16, 128], strides = [1, 1]} : vector<18x128xf32> to vector<16x128xf32>
    %17 = vector.extract_strided_slice %15 {offsets = [1, 0], sizes = [16, 128], strides = [1, 1]} : vector<18x128xf32> to vector<16x128xf32>
    %18 = vector.extract_strided_slice %15 {offsets = [2, 0], sizes = [16, 128], strides = [1, 1]} : vector<18x128xf32> to vector<16x128xf32>
    %19 = tpu.concatenate %16, %17, %18 in 1 : vector<16x128xf32>, vector<16x128xf32>, vector<16x128xf32> -> vector<16x384xf32>
    %c0_7 = arith.constant 0 : index
    %c0_8 = arith.constant 0 : index
    %20 = vector.load %arg4[%c0_7, %c0_8] : memref<384x128xf32, #tpu.memory_space<vmem>>, vector<384x128xf32>
    %cst_9 = arith.constant dense<0.000000e+00> : vector<16x128xf32>
    %21 = tpu.matmul %19, %20, %cst_9 {dimension_numbers = #tpu.dot_dimension_numbers<[1], [0], [0], [1], [0, 0, 1, 1], [], []>} : vector<16x384xf32>, vector<384x128xf32>, vector<16x128xf32> -> vector<16x128xf32>
    %c0_10 = arith.constant 0 : index
    %c0_11 = arith.constant 0 : index
    %22 = vector.load %arg5[%c0_10, %c0_11] : memref<1x128xf32, #tpu.memory_space<vmem>>, vector<1x128xf32>
    %23 = vector.broadcast %22 : vector<1x128xf32> to vector<16x128xf32>
    %24 = arith.addf %21, %23 : vector<16x128xf32>
    %cst_12 = arith.constant 0.000000e+00 : f32
    %25 = vector.broadcast %cst_12 : f32 to vector<16x128xf32>
    %26 = arith.maximumf %24, %25 : vector<16x128xf32>
    %27 = vector.extract_strided_slice %26 {offsets = [0, 0], sizes = [1, 128], strides = [1, 1]} : vector<16x128xf32> to vector<1x128xf32>
    %28 = vector.extract_strided_slice %26 {offsets = [15, 0], sizes = [1, 128], strides = [1, 1]} : vector<16x128xf32> to vector<1x128xf32>
    %29 = tpu.concatenate %27, %26, %28 in 0 : vector<1x128xf32>, vector<16x128xf32>, vector<1x128xf32> -> vector<18x128xf32>
    %c0_13 = arith.constant 0 : index
    %c0_14 = arith.constant 0 : index
    %c0_15 = arith.constant 0 : index
    %30 = vector.load %arg6[%c0_13, %c0_14, %c0_15] : memref<1x18x128xf32, #tpu.memory_space<vmem>>, vector<1x18x128xf32>
    %31 = vector.shape_cast %30 : vector<1x18x128xf32> to vector<18x128xf32>
    %32 = vector.shape_cast %29 : vector<18x128xf32> to vector<1x18x128xf32>
    tpu.vector_store %arg6[%c0_13, %c0_14, %c0_15], %32 {strides = array<i32>} : memref<1x18x128xf32, #tpu.memory_space<vmem>>, vector<1x18x128xf32>,
    %cst_16 = arith.constant dense<0.000000e+00> : vector<128xf32>
    %33 = vector.multi_reduction <add>, %26, %cst_16 [0] : vector<16x128xf32> to vector<128xf32>
    %34 = vector.shape_cast %33 : vector<128xf32> to vector<1x128xf32>
    %35 = arith.mulf %26, %26 : vector<16x128xf32>
    %cst_17 = arith.constant dense<0.000000e+00> : vector<128xf32>
    %36 = vector.multi_reduction <add>, %35, %cst_17 [0] : vector<16x128xf32> to vector<128xf32>
    %37 = vector.shape_cast %36 : vector<128xf32> to vector<1x128xf32>
    %38 = tpu.concatenate %34, %37 in 0 : vector<1x128xf32>, vector<1x128xf32> -> vector<2x128xf32>
    %c0_18 = arith.constant 0 : index
    %c0_19 = arith.constant 0 : index
    %c0_20 = arith.constant 0 : index
    %39 = vector.load %arg7[%c0_18, %c0_19, %c0_20] : memref<1x2x128xf32, #tpu.memory_space<vmem>>, vector<1x2x128xf32>
    %40 = vector.shape_cast %39 : vector<1x2x128xf32> to vector<2x128xf32>
    %41 = vector.shape_cast %38 : vector<2x128xf32> to vector<1x2x128xf32>
    tpu.vector_store %arg7[%c0_18, %c0_19, %c0_20], %41 {strides = array<i32>} : memref<1x2x128xf32, #tpu.memory_space<vmem>>, vector<1x2x128xf32>,
    return
  }
  func.func @transform_0(%arg0: i32) -> (i32, i32, i32) {
    %c0_i32 = arith.constant 0 : i32
    %c0_i32_0 = arith.constant 0 : i32
    %c0_i32_1 = arith.constant 0 : i32
    return %arg0, %c0_i32, %c0_i32_0 : i32, i32, i32
  }
  func.func @transform_1(%arg0: i32) -> (i32, i32) {
    %c0_i32 = arith.constant 0 : i32
    %c0_i32_0 = arith.constant 0 : i32
    %c0_i32_1 = arith.constant 0 : i32
    return %c0_i32, %c0_i32_0 : i32, i32
  }
  func.func @transform_2(%arg0: i32) -> (i32, i32) {
    %c0_i32 = arith.constant 0 : i32
    %c0_i32_0 = arith.constant 0 : i32
    %c0_i32_1 = arith.constant 0 : i32
    return %c0_i32, %c0_i32_0 : i32, i32
  }
  func.func @transform_3(%arg0: i32) -> (i32, i32) {
    %c0_i32 = arith.constant 0 : i32
    %c0_i32_0 = arith.constant 0 : i32
    %c0_i32_1 = arith.constant 0 : i32
    return %c0_i32, %c0_i32_0 : i32, i32
  }
  func.func @transform_4(%arg0: i32) -> (i32, i32) {
    %c0_i32 = arith.constant 0 : i32
    %c0_i32_0 = arith.constant 0 : i32
    %c0_i32_1 = arith.constant 0 : i32
    return %c0_i32, %c0_i32_0 : i32, i32
  }
  func.func @transform_5(%arg0: i32) -> (i32, i32, i32) {
    %c0_i32 = arith.constant 0 : i32
    %c0_i32_0 = arith.constant 0 : i32
    %c0_i32_1 = arith.constant 0 : i32
    return %arg0, %c0_i32, %c0_i32_0 : i32, i32, i32
  }
  func.func @transform_6(%arg0: i32) -> (i32, i32, i32) {
    %c0_i32 = arith.constant 0 : i32
    %c0_i32_0 = arith.constant 0 : i32
    %c0_i32_1 = arith.constant 0 : i32
    return %arg0, %c0_i32, %c0_i32_0 : i32, i32, i32
  }
}

</mosaic_0001>

<bundles_post_ra>
// kernel: tpu_custom_call.1
= control target key start
LH: loop header
LB: loop body
LE: loop exit
PB: predicated region body
PF: predicated region fallthrough
CT: control target
= control target key end

     0   :  { %12 = vsyncpa [#allocation3], 0  ;;  %s1191_s0 = inlined_call_operand.vmem [shape: f32[2,18,128], index: 0, kind: input, shape index: {}]   ;;  %s1192_s1 = inlined_call_operand.hbm [shape: f32[384,128], index: 1, kind: input, shape index: {}]   ;;  %s1193_s2 = inlined_call_operand.vmem [shape: f32[1,128], index: 2, kind: input, shape index: {}]   ;;  %s1194_s3 = inlined_call_operand.hbm [shape: f32[384,128], index: 3, kind: input, shape index: {}]   ;;  %s1195_s4 = inlined_call_operand.vmem [shape: f32[1,128], index: 4, kind: input, shape index: {}]   ;;  %s1196_s5 = inlined_call_operand.vmem [shape: f32[2,18,128], index: 5, kind: output, shape index: {0}]   ;;  %s1197_s6 = inlined_call_operand.hbm [shape: f32[2,2,128], index: 6, kind: output, shape index: {1}]  }
   0x1   :  { %13 = vsyncpa [#allocation6], 0 }
   0x2   :  { %14 = vsyncpa [#allocation4], 0 }
   0x3   :  { %16 = vsyncpa [#allocation4 + $0x1], 0  ;;  %s1040_s21 = smov 0   ;;  %s1042_s22 = smov 0  }
   0x4   :  { %s1044_s23 = smov 0   ;;  %s1046_s24 = smov 0  }
   0x5 LB: > { %s1061_s25 = sadd.s32 4294967295, %s999_s24   ;;  %s757_s26 = sadd.s32 4294967294, %s999_s24   ;;  %s999_s24 = sphi %s1046_s24, %s1204_s24   ;;  %s995_s23 = sphi %s1044_s23, %s1203_s23   ;;  %s991_s22 = sphi %s1042_s22, %s1202_s22   ;;  %s987_s21 = sphi %s1040_s21, %s1201_s21  }
   0x6   : > { %s1065_s27 = sadd.s32 1, %s999_s24   ;;  %s165_s28 = sadd.s32 1, %s995_s23 }
   0x7   : > { %s162_s29 = ssub.s32 %s999_s24, %s1065_s27  ;;  %p175_p0 = scmp.ne.s32.totalorder %s995_s23, %s991_s22 }
   0x8   : > { %p163_p1 = scmp.eq.s32.totalorder %s162_s29, 0  ;;  %p176_p2 = scmp.eq.s32.totalorder %s1061_s25, 1 }
   0x9   : > { %p181_p3 = scmp.ne.s32.totalorder %s991_s22, %s987_s21  ;;  %p182_p4 = scmp.eq.s32.totalorder %s757_s26, 1 }
   0xa   : > { %s1076_s30 = scalar_select %p163_p1, %s995_s23, %s165_s28  }
   0xb   : > { %p1078_p5 = por %p176_p2, %p175_p0  ;;  %p1082_p6 = por %p182_p4, %p181_p3 }
   0xc   : > { %p758_p7 = scmp.ge.s32.totalorder %s999_s24, 1  ;;  %p189_p8 = scmp.lt.s32.totalorder %s999_s24, 3 }
   0xd   : > { %p826_p9 = scmp.eq.s32.totalorder %s1061_s25, 0  ;;  %s200_s12 = sshll.u32 %s1192_s1, 4  ;;  %s201_s12 = int_to_ptr.hbm [resolvable:$true] %s200_s12 }
   0xe   : > { %p1089_p10 = pnand %p758_p7, %p189_p8  ;;  %s1001_s13 = smov [#allocation2]  }
   0xf   : > { %s202_s14 = sshll.u32 %s1001_s13, 4  ;;  %s217_s17 = sshll.u32 %s1194_s3, 4  ;;  %s203_s14 = int_to_ptr.vmem [resolvable:$true] %s202_s14  ;;  %s218_s17 = int_to_ptr.hbm [resolvable:$true] %s217_s17 }
  0x10   : > { %p815_p11 = pneg %p1089_p10  ;;  %s1002_s18 = smov 128  }
  0x11   : > { %s1003_s19 = smov 8   ;;  %s1004_s20 = smov [#allocation5]  }
  0x12   : > { %p816_p12 = pnand %p826_p9, %p815_p11  ;;  %s219_s26 = sshll.u32 %s1004_s20, 4  ;;  %s220_s26 = int_to_ptr.vmem [resolvable:$true] %s219_s26 }
  0x13   : > { %246 = sbr.rel (%p1089_p10) target bundleno = 370 (0x172), region = 40 }
  0x14   : > { %818 = dma.hbm_to_vmem [thread:$0]  (!%p816_p12), %s201_s12, 6144, %s203_s14, [#allocation3], %s1002_s18, %s1002_s18, %s1003_s19  }
  0x15   : > { %821 = dma.hbm_to_vmem [thread:$0]  (!%p816_p12), %s218_s17, 6144, %s220_s26, [#allocation6], %s1002_s18, %s1002_s18, %s1003_s19  }
  0x18   : > { %974 = dma.done.wait (%p826_p9), [#allocation3], 6144  }
  0x19   : > { %976 = vsyncadd (%p826_p9), [#allocation3], 4294961152 }
  0x1a   : > { %978 = dma.done.wait (%p826_p9), [#allocation6], 6144  }
  0x1b   : > { %980 = vsyncadd (%p826_p9), [#allocation6], 4294961152  ;;  %v366_v0 = vld [vmem:[#allocation2 + $0x178] sm:$0xff]  ;;  %v365_v2 = vld [vmem:[#allocation2 + $0x170] sm:$0xff]  ;;  %p287_p13 = scmp.lt.s32.totalorder %s1061_s25, 1  ;;  %vm311_vm0 = vcmask 1045504  }
  0x1c   : > { %v334_v1 = vld [vmem:[#allocation2 + $0x78] sm:$0xff]  ;;  %417 = vmatpush.msra.mxu2 %v366_v0  ;;  %v333_v3 = vld [vmem:[#allocation2 + $0x70] sm:$0xff]  ;;  %v364_v5 = vld [vmem:[#allocation2 + $0x168] sm:$0xff]  ;;  %vm303_vm1 = vcmask 1046528   ;;  %vm444_vm2 = vcmask 1040384   ;;  %s284_s19 = sand.u32 1, %s991_s22  }
  0x1d   : > { %371 = vmatpush.msra.mxu0 %v334_v1  ;;  %v350_v4 = vld [vmem:[#allocation2 + $0xf8] sm:$0xff]  ;;  %v332_v6 = vld [vmem:[#allocation2 + $0x68] sm:$0xff]  ;;  %v349_v7 = vld [vmem:[#allocation2 + $0xf0] sm:$0xff]  ;;  %s1115_s28 = scalar_select %p287_p13, %s1061_s25, 1 }
  0x1e   : > { %394 = vmatpush.msra.mxu1 %v350_v4  ;;  %418 = vmatpush.msra.mxu2 %v365_v2  ;;  %v348_v8 = vld [vmem:[#allocation2 + $0xe8] sm:$0xff]  ;;  %v363_v9 = vld [vmem:[#allocation2 + $0x160] sm:$0xff]  ;;  %v362_v12 = vld [vmem:[#allocation2 + $0x158] sm:$0xff]  ;;  %s765_s20 = sshll.u32 %s284_s19, 1  ;;  %s769_s26 = sshll.u32 %s1061_s25, 1 }
  0x1f   : > { %372 = vmatpush.msra.mxu0 %v333_v3  ;;  %v331_v10 = vld [vmem:[#allocation2 + $0x60] sm:$0xff]  ;;  %v330_v13 = vld [vmem:[#allocation2 + $0x58] sm:$0xff]  ;;  %v361_v15 = vld [vmem:[#allocation2 + $0x150] sm:$0xff]  ;;  %s804_s29 = smul.u32 24, %s1115_s28  ;;  %s646_s9 = scalar_lea.hbm %s1197_s6, %s769_s26 }
  0x20   : > { %395 = vmatpush.msra.mxu1 %v349_v7  ;;  %419 = vmatpush.msra.mxu2 %v364_v5  ;;  %v347_v11 = vld [vmem:[#allocation2 + $0xe0] sm:$0xff]  ;;  %v346_v14 = vld [vmem:[#allocation2 + $0xd8] sm:$0xff]  ;;  %v329_v16 = vld [vmem:[#allocation2 + $0x50] sm:$0xff]  ;;  %s286_s10 = scalar_lea.vmem [#allocation7], %s765_s20  ;;  %s650_s12 = sshll.u32 %s646_s9, 4  ;;  %s651_s12 = int_to_ptr.hbm [resolvable:$true] %s650_s12 }
  0x21   : > { %373 = vmatpush.msra.mxu0 %v332_v6  ;;  %v345_v17 = vld [vmem:[#allocation2 + $0xd0] sm:$0xff]  ;;  %v360_v18 = vld [vmem:[#allocation2 + $0x148] sm:$0xff]  ;;  %v359_v21 = vld [vmem:[#allocation2 + $0x140] sm:$0xff]  ;;  %s1123_s11 = scalar_lea.vmem %s1191_s0, %s804_s29  ;;  %s296_s18 = scalar_lea.vmem %s1196_s5, %s804_s29 }
  0x22   : > { %396 = vmatpush.msra.mxu1 %v348_v8  ;;  %420 = vmatpush.msra.mxu2 %v363_v9  ;;  %v328_v19 = vld [vmem:[#allocation2 + $0x48] sm:$0xff]  ;;  %v327_v22 = vld [vmem:[#allocation2 + $0x40] sm:$0xff]  ;;  %v358_v24 = vld [vmem:[#allocation2 + $0x138] sm:$0xff]  ;;  %s633_s25 = scalar_lea.sflag [#allocation4], %s284_s19  ;;  %s943_s13 = sshra.s32 %s651_s12, 4  ;;  %s944_s13 = int_to_ptr.hbm [resolvable:$true] %s943_s13 }
  0x23   : > { %374 = vmatpush.msra.mxu0 %v331_v10  ;;  %v344_v20 = vld [vmem:[#allocation2 + $0xc8] sm:$0xff]  ;;  %v343_v23 = vld [vmem:[#allocation2 + $0xc0] sm:$0xff]  ;;  %v326_v25 = vld [vmem:[#allocation2 + $0x38] sm:$0xff]  ;;  %s945_s14 = scalar_lea.hbm %s944_s13, 2  ;;  %s949_s17 = scalar_lea.hbm %s1197_s6, 4 }
  0x24   : > { %397 = vmatpush.msra.mxu1 %v347_v11  ;;  %421 = vmatpush.msra.mxu2 %v362_v12  ;;  %v342_v26 = vld [vmem:[#allocation2 + $0xb8] sm:$0xff]  ;;  %v357_v27 = vld [vmem:[#allocation2 + $0x130] sm:$0xff]  ;;  %v356_v32 = vld [vmem:[#allocation2 + $0x128] sm:$0xff]  ;;  %p946_p0 = scmp.ne.s32.totalorder %s944_s13, %s945_s14  ;;  %p950_p3 = scmp.lt.s32.totalorder %s944_s13, %s1197_s6 }
  0x25   : > { %375 = vmatpush.msra.mxu0 %v330_v13  ;;  %v325_v28 = vld [vmem:[#allocation2 + $0x30] sm:$0xff]  ;;  %v486_v30 = vld [vmem:[#allocation5 + $0x78] sm:$0xff]  ;;  %v324_v33 = vld [vmem:[#allocation2 + $0x28] sm:$0xff]  ;;  %p951_p4 = scmp.lt.s32.totalorder %s949_s17, %s945_s14 }
  0x26   : > { %398 = vmatpush.msra.mxu1 %v346_v14  ;;  %422 = vmatpush.msra.mxu2 %v361_v15  ;;  %v341_v29 = vld [vmem:[#allocation2 + $0xb0] sm:$0xff]  ;;  %v340_v34 = vld [vmem:[#allocation2 + $0xa8] sm:$0xff]  ;;  %v355_v36 = vld [vmem:[#allocation2 + $0x120] sm:$0xff]  ;;  %p947_p1 = pnand %p946_p0, %p1078_p5 }
  0x27   : > { %376 = vmatpush.msra.mxu0 %v329_v16  ;;  %v485_v31 = vld [vmem:[#allocation5 + $0x70] sm:$0xff]  ;;  %523 = vmatpush.msra.mxu3 %v486_v30  ;;  %v484_v35 = vld [vmem:[#allocation5 + $0x68] sm:$0xff]  ;;  %v323_v37 = vld [vmem:[#allocation2 + $0x20] sm:$0xff]  ;;  %p952_p7 = por %p951_p4, %p950_p3 }
  0x28   : > { %399 = vmatpush.msra.mxu1 %v345_v17  ;;  %423 = vmatpush.msra.mxu2 %v360_v18  ;;  %v354_v38 = vld [vmem:[#allocation2 + $0x118] sm:$0xff]  ;;  %v339_v39 = vld [vmem:[#allocation2 + $0xa0] sm:$0xff]  ;;  %v1127_v43 = vld [vmem:[%s1123_s11 + $0x8] sm:$0xff]  ;;  %p948_p2 = pneg %p947_p1 }
  0x29   : > { %377 = vmatpush.msra.mxu0 %v328_v19  ;;  %524 = vmatpush.msra.mxu3 %v485_v31  ;;  %v483_v40 = vld [vmem:[#allocation5 + $0x60] sm:$0xff]  ;;  %v322_v41 = vld [vmem:[#allocation2 + $0x18] sm:$0xff]  ;;  %v353_v46 = vld [vmem:[#allocation2 + $0x110] sm:$0xff]  ;;  %v313_v50 = vrot.slane %v1127_v43, 2  ;;  %v305_v56 = vrot.slane %v1127_v43, 1 }
  0x2a   : > { %400 = vmatpush.msra.mxu1 %v344_v20  ;;  %424 = vmatpush.msra.mxu2 %v359_v21  ;;  %v297_v42 = vld [vmem:[%s1123_s11] sm:$0xff]  ;;  %v338_v44 = vld [vmem:[#allocation2 + $0x98] sm:$0xff]  ;;  %v321_v47 = vld [vmem:[#allocation2 + $0x10] sm:$0xff]  ;;  %p953_p8 = pnand %p952_p7, %p948_p2 }
  0x2b   : > { %378 = vmatpush.msra.mxu0 %v327_v22  ;;  %525 = vmatpush.msra.mxu3 %v484_v35  ;;  %v482_v45 = vld [vmem:[#allocation5 + $0x58] sm:$0xff]  ;;  %v337_v48 = vld [vmem:[#allocation2 + $0x90] sm:$0xff]  ;;  %v312_v49 = vrot.slane %v297_v42, 2  ;;  %v352_v52 = vld [vmem:[#allocation2 + $0x108] sm:$0xff]  ;;  %v304_v55 = vrot.slane %v297_v42, 1 }
  0x2c   : > { %401 = vmatpush.msra.mxu1 %v343_v23  ;;  %425 = vmatpush.msra.mxu2 %v358_v24  ;;  %v481_v51 = vld [vmem:[#allocation5 + $0x50] sm:$0xff]  ;;  %v320_v53 = vld [vmem:[#allocation2 + $0x8] sm:$0xff]  ;;  %v351_v58 = vld [vmem:[#allocation2 + $0x100] sm:$0xff] }
  0x2d   : > { %379 = vmatpush.msra.mxu0 %v326_v25  ;;  %526 = vmatpush.msra.mxu3 %v483_v40  ;;  %v336_v54 = vld [vmem:[#allocation2 + $0x88] sm:$0xff]  ;;  %v319_v59 = vld [vmem:[#allocation2] sm:$0xff]  ;;  %v314_v60 = vsel %vm311_vm0, %v312_v49, %v313_v50  ;;  %v299_v62 = vld [vmem:[%s1123_s11 + $0x10] sm:$0x3]  ;;  %v306_v0 = vsel %vm303_vm1, %v304_v55, %v305_v56  ;;  %s648_s11 = sshll.u32 %s286_s10, 4  ;;  %s649_s11 = int_to_ptr.vmem [resolvable:$true] %s648_s11 }
  0x2e   : > { %402 = vmatpush.msra.mxu1 %v342_v26  ;;  %426 = vmatpush.msra.mxu2 %v357_v27  ;;  %v480_v57 = vld [vmem:[#allocation5 + $0x48] sm:$0xff]  ;;  %v335_v61 = vld [vmem:[#allocation2 + $0x80] sm:$0xff]  ;;  %v502_v1 = vld [vmem:[#allocation5 + $0xf8] sm:$0xff]  ;;  %v315_v3 = vrot.slane %v299_v62, 2  ;;  %v307_v7 = vrot.slane %v299_v62, 1 }
  0x2f   : > { %380 = vmatpush.msra.mxu0 %v325_v28  ;;  %527 = vmatpush.msra.mxu3 %v482_v45  ;;  %v479_v63 = vld [vmem:[#allocation5 + $0x40] sm:$0xff]  ;;  %v478_v2 = vld [vmem:[#allocation5 + $0x38] sm:$0xff]  ;;  %v501_v5 = vld [vmem:[#allocation5 + $0xf0] sm:$0xff] }
  0x30   : > { %403 = vmatpush.msra.mxu1 %v341_v29  ;;  %427 = vmatpush.msra.mxu2 %v356_v32  ;;  %v518_v4 = vld [vmem:[#allocation5 + $0x178] sm:$0xff]  ;;  %v477_v6 = vld [vmem:[#allocation5 + $0x30] sm:$0xff]  ;;  %v500_v9 = vld [vmem:[#allocation5 + $0xe8] sm:$0xff]  ;;  %v316_v11 = vsel %vm311_vm0, %v313_v50, %v315_v3  ;;  %v308_v14 = vsel %vm303_vm1, %v305_v56, %v307_v7 }
  0x31   : > { %381 = vmatpush.msra.mxu0 %v324_v33  ;;  %528 = vmatpush.msra.mxu3 %v481_v51  ;;  %v517_v8 = vld [vmem:[#allocation5 + $0x170] sm:$0xff]  ;;  %v476_v10 = vld [vmem:[#allocation5 + $0x28] sm:$0xff]  ;;  %v475_v12 = vld [vmem:[#allocation5 + $0x20] sm:$0xff] }
  0x32   : > { %404 = vmatpush.msra.mxu1 %v340_v34  ;;  %428 = vmatpush.msra.mxu2 %v355_v36  ;;  %v516_v13 = vld [vmem:[#allocation5 + $0x168] sm:$0xff]  ;;  %v499_v15 = vld [vmem:[#allocation5 + $0xe0] sm:$0xff]  ;;  %v474_v16 = vld [vmem:[#allocation5 + $0x18] sm:$0xff] }
  0x33   : > { %382 = vmatpush.msra.mxu0 %v323_v37  ;;  %529 = vmatpush.msra.mxu3 %v480_v57  ;;  %v515_v17 = vld [vmem:[#allocation5 + $0x160] sm:$0xff]  ;;  %v473_v18 = vld [vmem:[#allocation5 + $0x10] sm:$0xff]  ;;  %v472_v19 = vld [vmem:[#allocation5 + $0x8] sm:$0xff] }
  0x34   : > { %405 = vmatpush.msra.mxu1 %v339_v39  ;;  %429 = vmatpush.msra.mxu2 %v354_v38  ;;  %v471_v20 = vld [vmem:[#allocation5] sm:$0xff]  ;;  %v498_v21 = vld [vmem:[#allocation5 + $0xd8] sm:$0xff]  ;;  %v497_v23 = vld [vmem:[#allocation5 + $0xd0] sm:$0xff] }
  0x35   : > { %383 = vmatpush.msra.mxu0 %v322_v41  ;;  %530 = vmatpush.msra.mxu3 %v479_v63  ;;  %v514_v22 = vld [vmem:[#allocation5 + $0x158] sm:$0xff]  ;;  %v513_v24 = vld [vmem:[#allocation5 + $0x150] sm:$0xff]  ;;  %v496_v25 = vld [vmem:[#allocation5 + $0xc8] sm:$0xff] }
  0x36   : > { %406 = vmatpush.msra.mxu1 %v338_v44  ;;  %430 = vmatpush.msra.mxu2 %v353_v46  ;;  %v512_v26 = vld [vmem:[#allocation5 + $0x148] sm:$0xff]  ;;  %v495_v27 = vld [vmem:[#allocation5 + $0xc0] sm:$0xff]  ;;  %v494_v29 = vld [vmem:[#allocation5 + $0xb8] sm:$0xff] }
  0x37   : > { %384 = vmatpush.msra.mxu0 %v321_v47  ;;  %531 = vmatpush.msra.mxu3 %v478_v2  ;;  %v511_v28 = vld [vmem:[#allocation5 + $0x140] sm:$0xff]  ;;  %v510_v30 = vld [vmem:[#allocation5 + $0x138] sm:$0xff]  ;;  %v493_v31 = vld [vmem:[#allocation5 + $0xb0] sm:$0xff] }
  0x38   : > { %407 = vmatpush.msra.mxu1 %v337_v48  ;;  %431 = vmatpush.msra.mxu2 %v352_v52  ;;  %v509_v32 = vld [vmem:[#allocation5 + $0x130] sm:$0xff]  ;;  %v492_v33 = vld [vmem:[#allocation5 + $0xa8] sm:$0xff]  ;;  %v491_v35 = vld [vmem:[#allocation5 + $0xa0] sm:$0xff] }
  0x39   : > { %385 = vmatpush.msra.mxu0 %v320_v53  ;;  %532 = vmatpush.msra.mxu3 %v477_v6  ;;  %v508_v34 = vld [vmem:[#allocation5 + $0x128] sm:$0xff]  ;;  %v507_v36 = vld [vmem:[#allocation5 + $0x120] sm:$0xff]  ;;  %v490_v37 = vld [vmem:[#allocation5 + $0x98] sm:$0xff] }
  0x3a   : > { %408 = vmatpush.msra.mxu1 %v336_v54  ;;  %432 = vmatpush.msra.mxu2 %v351_v58  ;;  %v506_v38 = vld [vmem:[#allocation5 + $0x118] sm:$0xff]  ;;  %v489_v39 = vld [vmem:[#allocation5 + $0x90] sm:$0xff]  ;;  %v488_v41 = vld [vmem:[#allocation5 + $0x88] sm:$0xff] }
  0x3b   : > { %386 = vmatpush.msra.mxu0 %v319_v59  ;;  %433 = vmatmul.f32.vlgmr.msra.gmra.mxu2 %v314_v60  ;;  %v505_v40 = vld [vmem:[#allocation5 + $0x110] sm:$0xff]  ;;  %v503_v44 = vld [vmem:[#allocation5 + $0x100] sm:$0xff] }
  0x3c   : > { %387 = vmatmul.f32.vlgmr.msra.gmra.mxu0 %v297_v42  ;;  %409 = vmatpush.msra.mxu1 %v335_v61  ;;  %v504_v42 = vld [vmem:[#allocation5 + $0x108] sm:$0xff]  ;;  %v867_v45 = vld [vmem:[%s1193_s2] ss:$0 sm:$0xff] }
  0x3d   : > { %410 = vmatmul.f32.vlgmr.msra.gmra.mxu1 %v306_v0  ;;  %546 = vmatpush.msrb.mxu0 %v502_v1 }
  0x3e   : > { %772 = vmatpush.msrb.mxu2 %v502_v1  ;;  %569 = vmatpush.msrb.mxu1 %v518_v4 }
  0x3f   : > { %547 = vmatpush.msrb.mxu0 %v501_v5  ;;  %533 = vmatpush.msra.mxu3 %v476_v10 }
  0x40   : > { %773 = vmatpush.msrb.mxu2 %v501_v5  ;;  %570 = vmatpush.msrb.mxu1 %v517_v8 }
  0x41   : > { %548 = vmatpush.msrb.mxu0 %v500_v9  ;;  %534 = vmatpush.msra.mxu3 %v475_v12  ;;  %v868_v12 = vld [vmem:[%s1195_s4] ss:$0 sm:$0xff] }
  0x42   : > { %774 = vmatpush.msrb.mxu2 %v500_v9  ;;  %571 = vmatpush.msrb.mxu1 %v516_v13 }
  0x43   : > { %436 = vmatmul.f32.gmra.mxu2 %v316_v11  ;;  %549 = vmatpush.msrb.mxu0 %v499_v15 }
  0x44   : > { %390 = vmatmul.f32.gmra.mxu0 %v1127_v43  ;;  %535 = vmatpush.msra.mxu3 %v474_v16  ;;  %v487_v43 = vld [vmem:[#allocation5 + $0x80] sm:$0xff] }
  0x45   : > { %413 = vmatmul.f32.gmra.mxu1 %v308_v14  ;;  %775 = vmatpush.msrb.mxu2 %v499_v15 }
  0x46   : > { %572 = vmatpush.msrb.mxu1 %v515_v17  ;;  %536 = vmatpush.msra.mxu3 %v473_v18 }
  0x47   : > { %550 = vmatpush.msrb.mxu0 %v498_v21  ;;  %776 = vmatpush.msrb.mxu2 %v498_v21 }
  0x48   : > { %537 = vmatpush.msra.mxu3 %v472_v19  ;;  %573 = vmatpush.msrb.mxu1 %v514_v22 }
  0x49   : > { %551 = vmatpush.msrb.mxu0 %v497_v23  ;;  %777 = vmatpush.msrb.mxu2 %v497_v23 }
  0x4a   : > { %538 = vmatpush.msra.mxu3 %v471_v20  ;;  %574 = vmatpush.msrb.mxu1 %v513_v24 }
  0x4b   : > { %552 = vmatpush.msrb.mxu0 %v496_v25  ;;  %778 = vmatpush.msrb.mxu2 %v496_v25 }
  0x4c   : > { %788 = vmatpush.msrb.mxu3 %v518_v4  ;;  %575 = vmatpush.msrb.mxu1 %v512_v26 }
  0x4d   : > { %553 = vmatpush.msrb.mxu0 %v495_v27  ;;  %779 = vmatpush.msrb.mxu2 %v495_v27 }
  0x4e   : > { %789 = vmatpush.msrb.mxu3 %v517_v8  ;;  %576 = vmatpush.msrb.mxu1 %v511_v28 }
  0x4f   : > { %554 = vmatpush.msrb.mxu0 %v494_v29  ;;  %780 = vmatpush.msrb.mxu2 %v494_v29 }
  0x50   : > { %790 = vmatpush.msrb.mxu3 %v516_v13  ;;  %577 = vmatpush.msrb.mxu1 %v510_v30 }
  0x51   : > { %555 = vmatpush.msrb.mxu0 %v493_v31  ;;  %781 = vmatpush.msrb.mxu2 %v493_v31 }
  0x52   : > { %791 = vmatpush.msrb.mxu3 %v515_v17  ;;  %578 = vmatpush.msrb.mxu1 %v509_v32 }
  0x53   : > { %556 = vmatpush.msrb.mxu0 %v492_v33  ;;  %782 = vmatpush.msrb.mxu2 %v492_v33 }
  0x54   : > { %792 = vmatpush.msrb.mxu3 %v514_v22  ;;  %579 = vmatpush.msrb.mxu1 %v508_v34 }
  0x55   : > { %557 = vmatpush.msrb.mxu0 %v491_v35  ;;  %783 = vmatpush.msrb.mxu2 %v491_v35 }
  0x56   : > { %793 = vmatpush.msrb.mxu3 %v513_v24  ;;  %580 = vmatpush.msrb.mxu1 %v507_v36 }
  0x57   : > { %558 = vmatpush.msrb.mxu0 %v490_v37  ;;  %784 = vmatpush.msrb.mxu2 %v490_v37 }
  0x58   : > { %794 = vmatpush.msrb.mxu3 %v512_v26  ;;  %581 = vmatpush.msrb.mxu1 %v506_v38 }
  0x59   : > { %559 = vmatpush.msrb.mxu0 %v489_v39  ;;  %785 = vmatpush.msrb.mxu2 %v489_v39 }
  0x5a   : > { %795 = vmatpush.msrb.mxu3 %v511_v28  ;;  %582 = vmatpush.msrb.mxu1 %v505_v40 }
  0x5b   : > { %560 = vmatpush.msrb.mxu0 %v488_v41  ;;  %786 = vmatpush.msrb.mxu2 %v488_v41 }
  0x5c   : > { %796 = vmatpush.msrb.mxu3 %v510_v30  ;;  %583 = vmatpush.msrb.mxu1 %v504_v42 }
  0x5d   : > { %561 = vmatpush.msrb.mxu0 %v487_v43  ;;  %787 = vmatpush.msrb.mxu2 %v487_v43 }
  0x5e   : > { %797 = vmatpush.msrb.mxu3 %v509_v32  ;;  %584 = vmatpush.msrb.mxu1 %v503_v44 }
  0x60   : > { %798 = vmatpush.msrb.mxu3 %v508_v34 }
  0x62   : > { %799 = vmatpush.msrb.mxu3 %v507_v36 }
  0x64   : > { %800 = vmatpush.msrb.mxu3 %v506_v38 }
  0x66   : > { %801 = vmatpush.msrb.mxu3 %v505_v40 }
  0x68   : > { %802 = vmatpush.msrb.mxu3 %v504_v42 }
  0x6a   : > { %803 = vmatpush.msrb.mxu3 %v503_v44 }
  0xb9   : > { %v388_v46 = vpop.f32.mrf.mxu0 }
  0xba   : > { %v389_v47 = vadd.f32 %v867_v45, %v388_v46  ;;  %v411_v48 = vpop.f32.mrf.mxu1 }
  0xbc   : > { %v412_v49 = vadd.f32 %v411_v48, %v389_v47 }
  0xbe   : > { %v434_v50 = vpop.f32.mrf.mxu2 }
  0xbf   : > { %v435_v51 = vadd.f32 %v434_v50, %v412_v49 }
  0xc1   : > { %v391_v52 = vpop.f32.mrf.mxu0  ;;  %v440_v53 = vmax.f32 %v435_v51, 0.0 }
  0xc2   : > { %v392_v54 = vadd.f32 %v867_v45, %v391_v52  ;;  %v414_v55 = vpop.f32.mrf.mxu1 }
  0xc3   : > { %v445_v56 = vrot.slane %v440_v53, 7 }
  0xc4   : > { %v415_v57 = vadd.f32 %v414_v55, %v392_v54 }
  0xc5   : > { %v453_v58 = vsel %vm444_vm2, %v440_v53, %v445_v56 }
  0xc6   : > { %v437_v59 = vpop.f32.mrf.mxu2  ;;  %539 = vmatmul.f32.vlgmr.msra.gmra.mxu3 %v453_v58  ;;  %v457_v0 = vrot.slane %v453_v58, 1  ;;  %v464_v3 = vrot.slane %v453_v58, 2 }
  0xc7   : > { %v438_v60 = vadd.f32 %v437_v59, %v415_v57 }
  0xc9   : > { %v441_v61 = vmax.f32 %v438_v60, 0.0 }
  0xcb   : > { %v446_v62 = vrot.slane %v441_v61, 7  ;;  %v451_v63 = vrot.slane %v441_v61, 6 }
  0xcd   : > { %v447_v1 = vsel %vm444_vm2, %v445_v56, %v446_v62  ;;  %v454_v2 = vsel %vm444_vm2, %v446_v62, %v451_v63 }
  0xce   : > { %v458_v4 = vrot.slane %v447_v1, 1  ;;  %v465_v5 = vrot.slane %v447_v1, 2  ;;  %542 = vmatmul.f32.gmra.mxu3 %v447_v1  ;;  %v460_v6 = vrot.slane %v454_v2, 1  ;;  %v467_v10 = vrot.slane %v454_v2, 2 }
  0xd0   : > { %v459_v7 = vsel %vm303_vm1, %v457_v0, %v458_v4  ;;  %v461_v8 = vsel %vm303_vm1, %v458_v4, %v460_v6  ;;  %v466_v9 = vsel %vm311_vm0, %v464_v3, %v465_v5  ;;  %v468_v11 = vsel %vm311_vm0, %v465_v5, %v467_v10 }
  0xd1   : > { %562 = vmatmul.f32.vlgmr.msrb.gmra.mxu0 %v459_v7  ;;  %565 = vmatmul.f32.vlgmr.msrb.gmra.mxu2 %v461_v8 }
  0xd2   : > { %585 = vmatmul.f32.vlgmr.msrb.gmra.mxu1 %v466_v9 }
  0xd6   : > { %588 = vmatmul.f32.vlgmr.msrb.gmra.mxu3 %v468_v11 }
 0x149   : > { %v540_v13 = vpop.f32.mrf.mxu3 }
 0x14a   : > { %v541_v14 = vadd.f32 %v868_v12, %v540_v13 }
 0x14e   : > { %v563_v15 = vpop.f32.mrf.mxu0 }
 0x14f   : > { %v564_v16 = vadd.f32 %v563_v15, %v541_v14  ;;  %v586_v17 = vpop.f32.mrf.mxu1 }
 0x151   : > { %v587_v18 = vadd.f32 %v586_v17, %v564_v16  ;;  %v543_v19 = vpop.f32.mrf.mxu3 }
 0x152   : > { %v544_v21 = vadd.f32 %v868_v12, %v543_v19 }
 0x153   : > { %v592_v20 = vmax.f32 %v587_v18, 0.0 }
 0x154   : > { %v566_v23 = vpop.f32.mrf.mxu2 }
 0x155   : > { %v596_v22 = vrot.slane %v592_v20, 7  ;;  %v567_v25 = vadd.f32 %v566_v23, %v544_v21  ;;  %v616_v29 = vmul.f32 %v592_v20, %v592_v20 }
 0x157   : > { %v604_v24 = vsel %vm444_vm2, %v592_v20, %v596_v22 }
 0x158   : > { %606 = vst [vmem:[%s296_s18] sm:$0xff] %v604_v24 }
 0x159   : > { %v589_v26 = vpop.f32.mrf.mxu3 }
 0x15a   : > { %v590_v27 = vadd.f32 %v589_v26, %v567_v25 }
 0x15c   : > { %v593_v28 = vmax.f32 %v590_v27, 0.0 }
 0x15e   : > { %v597_v30 = vrot.slane %v593_v28, 7  ;;  %v602_v31 = vrot.slane %v593_v28, 6  ;;  %v609_v32 = vadd.f32 %v593_v28, %v592_v20  ;;  %v617_v33 = vmul.f32 %v593_v28, %v593_v28 }
 0x160   : > { %v598_v34 = vsel %vm444_vm2, %v596_v22, %v597_v30  ;;  %v605_v35 = vsel %vm444_vm2, %v597_v30, %v602_v31  ;;  %v610_v36 = vrot.slane %v609_v32, 4  ;;  %v618_v37 = vadd.f32 %v617_v33, %v616_v29 }
 0x161   : > { %607 = vst [vmem:[%s296_s18 + $0x8] sm:$0xff] %v598_v34 }
 0x162   : > { %608 = vst [vmem:[%s296_s18 + $0x10] sm:$0x3] %v605_v35  ;;  %v611_v38 = vadd.f32 %v610_v36, %v609_v32  ;;  %v619_v39 = vrot.slane %v618_v37, 4 }
 0x164   : > { %v612_v40 = vrot.slane %v611_v38, 2  ;;  %v620_v41 = vadd.f32 %v619_v39, %v618_v37 }
 0x166   : > { %v613_v42 = vadd.f32 %v612_v40, %v611_v38  ;;  %v621_v43 = vrot.slane %v620_v41, 2 }
 0x168   : > { %v614_v44 = vrot.slane %v613_v42, 1  ;;  %v622_v45 = vadd.f32 %v621_v43, %v620_v41 }
 0x16a   : > { %v623_v46 = vrot.slane %v622_v45, 1  ;;  %v615_v47 = vadd.f32 %v614_v44, %v613_v42 }
 0x16c   : > { %v624_v48 = vadd.f32 %v623_v46, %v622_v45 }
 0x16e   : > { %v625_v49 = vsel %vm444_vm2, %v615_v47, %v624_v48 }
 0x16f   : > { %626 = vst [vmem:[%s286_s10] sm:$0x3] %v625_v49 }
 0x170   : > { %956 = shalt.err (!%p953_p8)
}
 0x171   : > { %813 = dma.vmem_to_hbm [thread:$0]  (%p1078_p5), %s649_s11, 32, %s651_s12, %s633_s25  }
 0x172 PF: > { %p830_p9 = scmp.ge.s32.totalorder %s999_s24, 2  ;;  %s670_s19 = sand.u32 1, %s987_s21  }
 0x173   : > { %s671_s26 = scalar_lea.sflag [#allocation4], %s670_s19 }
 0x174   : > { %p823_p10 = pnand %p830_p9, %p1082_p6 }
 0x176   : > { %p824_p11 = pneg %p823_p10 }
 0x178   : > { %982 = dma.done.wait (%p824_p11), %s671_s26, 32  }
 0x179   : > { %984 = vsyncadd (%p824_p11), %s671_s26, 4294967264  ;;  %p19_p12 = scmp.ge.s32.totalorder %s1065_s27, 4   ;;  %s1201_s21 = smov %s991_s22 }
 0x17a   : > { %s1202_s22 = smov %s995_s23  ;;  %s1203_s23 = smov %s1076_s30 }
 0x17b   : > { %s1204_s24 = smov %s1065_s27  ;;  %21 = sbr.rel (!%p19_p12) target bundleno = 5 (0x5), region = 96 }
 0x180   :  { %677 = vsyncpa [#allocation3], 1 }
 0x181   :  { %679 = vsyncpa [#allocation3 + $0x1], 1 }
 0x182   :  { %680 = vsyncpa [#allocation6], 1 }
 0x183   :  { %681 = vsyncpa [#allocation4], 1 }
 0x184   :  { %683 = vsyncpa [#allocation4 + $0x1], 1 }

</bundles_post_ra>
